<compile_context>
chip_gen: v5e
topology: v5e:2x2
jax: 0.10.0
libtpu: 0.0.40
codegen_flags: <defaults>
</compile_context>

<pallas_src>
import functools

import jax
import jax.numpy as jnp
from jax import lax
from jax.experimental import pallas as pl
from jax.experimental.pallas import tpu as pltpu


def _mlp_kernel(x_ref, w1_ref, b1_ref, w2_ref, b2_ref, o_ref, *,
                chunk, n_chunks, approximate_gelu):
    # x_ref : (C_in, TM)      w1_ref: (C_mid, C_in)   b1_ref: (C_mid, 1)
    # w2_ref: (C_out, C_mid)  b2_ref: (C_out, 1)      o_ref : (C_out, TM)
    mm_dtype = w1_ref.dtype            # bf16 by default (pre-cast in wrapper)
    w1 = w1_ref[...]
    w2 = w2_ref[...]
    c_mid = w1.shape[0]
    c_out = w2.shape[0]

    # Hoist the bias lane-broadcasts out of the sub-chunk loop (JAX does not
    # CSE broadcast_in_dim, so doing it per chunk would repeat the work).
    b1 = jnp.broadcast_to(b1_ref[...].astype(jnp.float32), (c_mid, chunk))
    b2 = jnp.broadcast_to(b2_ref[...].astype(jnp.float32), (c_out, chunk))

    def compute(x):
        # Matmul operands in mm_dtype, f32 accumulation on the MXU.
        h = jnp.dot(w1, x.astype(mm_dtype),
                    preferred_element_type=jnp.float32) + b1
        if approximate_gelu:
            # tanh-GELU: transcendental lands on the EUP slot (v6e/v7x win).
            h = jax.nn.gelu(h, approximate=True)
        else:
            # Exact GELU (PyTorch F.gelu default), kept in f32 on all chips.
            h = 0.5 * h * (1.0 + lax.erf(h * jnp.float32(0.7071067811865476)))
        o = jnp.dot(w2, h.astype(mm_dtype),
                    preferred_element_type=jnp.float32) + b2
        return o.astype(o_ref.dtype)

    if n_chunks == 1:
        o_ref[...] = compute(x_ref[...])
    else:
        # Sub-chunk the lane dim so the live set stays a handful of vregs
        # instead of materializing the whole (C_mid, TM) intermediate.
        def body(i, carry):
            off = pl.multiple_of(i * chunk, chunk)
            o_ref[:, pl.ds(off, chunk)] = compute(x_ref[:, pl.ds(off, chunk)])
            return carry

        lax.fori_loop(0, n_chunks, body, 0, unroll=True)


def _pick_tile(dhw, cap):
    """Largest lane tile <= cap that divides DHW (prefers multiples of 512)."""
    cap = max(128, (cap // 128) * 128)
    if dhw <= cap:
        return dhw
    for step in (512, 128):
        t = (cap // step) * step
        while t >= step:
            if dhw % t == 0:
                return t
            t -= step
    return cap  # ragged tail; Pallas masks the partial last store


def _pick_chunk(tm, cap=512):
    """Largest multiple of 128 <= cap that divides TM, else the whole tile."""
    c = min((cap // 128) * 128, (tm // 128) * 128)
    while c >= 128:
        if tm % c == 0:
            return c
        c -= 128
    return tm


@functools.partial(jax.jit,
                   static_argnames=("tile_m", "use_bf16_matmul",
                                    "approximate_gelu"))
def mlp_forward(x, w1, b1, w2, b2, *, tile_m=8192, use_bf16_matmul=True,
                approximate_gelu=False):
    """x: (B, C_in, D, H, W) -> (B, C_out, D, H, W).  Conv weights are
    PyTorch Conv3d(kernel_size=1)-shaped: w1 (C_mid, C_in, 1, 1, 1),
    b1 (C_mid,), w2 (C_out, C_mid, 1, 1, 1), b2 (C_out,)."""
    B, C_in, D, H, W = x.shape
    C_mid = w1.shape[0]
    C_out = w2.shape[0]
    DHW = D * H * W
    itemsize = jnp.dtype(x.dtype).itemsize

    # Channels-on-sublanes / spatial-on-lanes: pure reshape of NCDHW.
    x_flat = x.reshape(B, C_in, DHW)

    tm = _pick_tile(DHW, tile_m)
    chunk = _pick_chunk(tm)
    n_chunks = tm // chunk if (chunk > 0 and tm % chunk == 0) else 1
    if n_chunks == 1:
        chunk = tm
    grid = (B, pl.cdiv(DHW, tm))

    # bf16 matmul operands (MXU-native on all generations); accumulation and
    # all elementwise math stay f32.  Weights pre-cast once here (also halves
    # their DMA bytes); the x tile is cast per sub-chunk inside the kernel.
    mm_dtype = jnp.bfloat16 if use_bf16_matmul else x.dtype
    w1_mat = w1.reshape(C_mid, C_in).astype(mm_dtype)
    w2_mat = w2.reshape(C_out, C_mid).astype(mm_dtype)
    b1_col = b1.reshape(C_mid, 1).astype(jnp.float32)
    b2_col = b2.reshape(C_out, 1).astype(jnp.float32)

    # Explicit scoped-VMEM budget: double-buffered in/out slabs + weights +
    # margin, clamped to [32 MiB, 64 MiB] (valid on v5e/v6e 128 MiB physical
    # and v7x 64 MiB physical; well above v5e's 16 MiB scoped default).
    block_io_bytes = (C_in + C_out) * tm * itemsize
    weight_bytes = ((C_mid * C_in + C_out * C_mid)
                    * jnp.dtype(mm_dtype).itemsize + (C_mid + C_out) * 4)
    vmem_limit = 2 * block_io_bytes + 2 * weight_bytes + (8 << 20)
    vmem_limit = int(min(max(vmem_limit, 32 << 20), 64 << 20))

    cost = pl.CostEstimate(
        flops=2 * B * DHW * (C_in * C_mid + C_mid * C_out),
        transcendentals=B * DHW * C_mid,
        bytes_accessed=B * DHW * (C_in + C_out) * itemsize + weight_bytes,
    )

    kernel = functools.partial(_mlp_kernel, chunk=chunk, n_chunks=n_chunks,
                               approximate_gelu=approximate_gelu)

    out_flat = pl.pallas_call(
        kernel,
        out_shape=jax.ShapeDtypeStruct((B, C_out, DHW), x.dtype),
        grid_spec=pltpu.PrefetchScalarGridSpec(
            num_scalar_prefetch=0,
            grid=grid,
            in_specs=[
                pl.BlockSpec((None, C_in, tm), lambda b, i: (b, 0, i)),
                pl.BlockSpec((C_mid, C_in), lambda b, i: (0, 0)),
                pl.BlockSpec((C_mid, 1), lambda b, i: (0, 0)),
                pl.BlockSpec((C_out, C_mid), lambda b, i: (0, 0)),
                pl.BlockSpec((C_out, 1), lambda b, i: (0, 0)),
            ],
            out_specs=pl.BlockSpec((None, C_out, tm), lambda b, i: (b, 0, i)),
        ),
        compiler_params=pltpu.CompilerParams(
            dimension_semantics=("parallel", "parallel"),
            vmem_limit_bytes=vmem_limit),
        cost_estimate=cost,
    )(x_flat, w1_mat, b1_col, w2_mat, b2_col)

    return out_flat.reshape(B, C_out, D, H, W)


def _reference(x, w1, b1, w2, b2):
    """Pure-JAX reference in f32 at HIGHEST matmul precision."""
    B, C_in, D, H, W = x.shape
    C_mid, C_out = w1.shape[0], w2.shape[0]
    xr = jnp.transpose(x, (0, 2, 3, 4, 1)).reshape(-1, C_in)
    h = jnp.dot(xr, w1.reshape(C_mid, C_in).T,
                precision=lax.Precision.HIGHEST) + b1
    h = 0.5 * h * (1.0 + lax.erf(h * 0.7071067811865476))
    o = jnp.dot(h, w2.reshape(C_out, C_mid).T,
                precision=lax.Precision.HIGHEST) + b2
    return jnp.transpose(o.reshape(B, D, H, W, C_out), (0, 4, 1, 2, 3))


if __name__ == "__main__":
    key = jax.random.PRNGKey(0)
    keys = jax.random.split(key, 9)

    # Small shapes consistent with FNO3d(width=2): the mlp0..mlp3 blocks are
    # MLP(width, width, width); the q head is MLP(width, 1, 4 * width).
    B, width = 2, 2
    D, H, W = 8, 8, 16  # DHW = 1024 (multiple of 512 -> no ragged tiles)

    x = jax.random.normal(keys[0], (B, width, D, H, W), dtype=jnp.float32)

    # mlp0-style block: width -> width, mid = width.
    w1 = jax.random.normal(keys[1], (width, width, 1, 1, 1), jnp.float32) * 0.1
    b1 = jax.random.normal(keys[2], (width,), jnp.float32) * 0.1
    w2 = jax.random.normal(keys[3], (width, width, 1, 1, 1), jnp.float32) * 0.1
    b2 = jax.random.normal(keys[4], (width,), jnp.float32) * 0.1

    # q head: width -> 1, mid = 4 * width.
    w1q = jax.random.normal(keys[5], (4 * width, width, 1, 1, 1), jnp.float32) * 0.1
    b1q = jax.random.normal(keys[6], (4 * width,), jnp.float32) * 0.1
    w2q = jax.random.normal(keys[7], (1, 4 * width, 1, 1, 1), jnp.float32) * 0.1
    b2q = jax.random.normal(keys[8], (1,), jnp.float32) * 0.1

    # 1) Default path: bf16 matmul operands, exact-erf GELU, single big tile
    #    with the in-kernel 512-lane sub-chunk loop.  bf16-class matmul error
    #    is accepted and documented -> compare against f32/HIGHEST reference
    #    at bf16-appropriate tolerance.
    out = mlp_forward(x, w1, b1, w2, b2)
    jax.block_until_ready(out)
    ref = _reference(x, w1, b1, w2, b2)
    assert out.shape == (B, width, D, H, W), out.shape
    assert jnp.allclose(out, ref, atol=1e-2, rtol=1e-2), "bf16 mlp mismatch"

    # 2) f32-operand path on a multi-tile grid (tile_m=512 -> grid (2, 2)).
    out_f32 = mlp_forward(x, w1, b1, w2, b2, tile_m=512, use_bf16_matmul=False)
    jax.block_until_ready(out_f32)
    assert jnp.allclose(out_f32, ref, atol=1e-4, rtol=1e-4), "f32 mlp mismatch"

    # 3) q head (C_out = 1, C_mid = 4 * width), default bf16 path.
    out_q = mlp_forward(x, w1q, b1q, w2q, b2q)
    jax.block_until_ready(out_q)
    ref_q = _reference(x, w1q, b1q, w2q, b2q)
    assert out_q.shape == (B, 1, D, H, W), out_q.shape
    assert jnp.allclose(out_q, ref_q, atol=1e-2, rtol=1e-2), "q head mismatch"

    print("KERNEL_OK")
</pallas_src>

<mosaic_0001>
module attributes {stable_mosaic.version = 11 : i64} {
  func.func @_mlp_kernel(%arg0: i32, %arg1: i32, %arg2: memref<1x2x1024xf32, #tpu.memory_space<vmem>>, %arg3: memref<2x2xbf16, #tpu.memory_space<vmem>>, %arg4: memref<2x1xf32, #tpu.memory_space<vmem>>, %arg5: memref<2x2xbf16, #tpu.memory_space<vmem>>, %arg6: memref<2x1xf32, #tpu.memory_space<vmem>>, %arg7: memref<1x2x1024xf32, #tpu.memory_space<vmem>>) attributes {dimension_semantics = [#tpu.dimension_semantics<parallel>, #tpu.dimension_semantics<parallel>], iteration_bounds = array<i64: 2, 1>, scalar_prefetch = 0 : i64, scratch_operands = 0 : i64, tpu.core_type = #tpu.core_type<tc>, window_params = [{transform_indices = @transform_0, window_bounds = array<i64: 1, 2, 1024>}, {pipeline_mode = #tpu.pipeline_mode<synchronous>, transform_indices = @transform_1, window_bounds = array<i64: 2, 2>}, {pipeline_mode = #tpu.pipeline_mode<synchronous>, transform_indices = @transform_2, window_bounds = array<i64: 2, 1>}, {pipeline_mode = #tpu.pipeline_mode<synchronous>, transform_indices = @transform_3, window_bounds = array<i64: 2, 2>}, {pipeline_mode = #tpu.pipeline_mode<synchronous>, transform_indices = @transform_4, window_bounds = array<i64: 2, 1>}, {transform_indices = @transform_5, window_bounds = array<i64: 1, 2, 1024>}]} {
    %c0 = arith.constant 0 : index
    %c0_0 = arith.constant 0 : index
    %0 = vector.load %arg3[%c0, %c0_0] : memref<2x2xbf16, #tpu.memory_space<vmem>>, vector<2x2xbf16>
    %c0_1 = arith.constant 0 : index
    %c0_2 = arith.constant 0 : index
    %1 = vector.load %arg5[%c0_1, %c0_2] : memref<2x2xbf16, #tpu.memory_space<vmem>>, vector<2x2xbf16>
    %c0_3 = arith.constant 0 : index
    %c0_4 = arith.constant 0 : index
    %2 = vector.load %arg4[%c0_3, %c0_4] : memref<2x1xf32, #tpu.memory_space<vmem>>, vector<2x1xf32>
    %3 = vector.shape_cast %2 : vector<2x1xf32> to vector<2x1xf32>
    %4 = vector.broadcast %3 : vector<2x1xf32> to vector<2x512xf32>
    %c0_5 = arith.constant 0 : index
    %c0_6 = arith.constant 0 : index
    %5 = vector.load %arg6[%c0_5, %c0_6] : memref<2x1xf32, #tpu.memory_space<vmem>>, vector<2x1xf32>
    %6 = vector.shape_cast %5 : vector<2x1xf32> to vector<2x1xf32>
    %7 = vector.broadcast %6 : vector<2x1xf32> to vector<2x512xf32>
    %c0_i32 = arith.constant 0 : i32
    %c512_i32 = arith.constant 512 : i32
    %8 = arith.muli %c0_i32, %c512_i32 : i32
    %9 = tpu.assume_multiple %8, 512 : i32
    %c0_7 = arith.constant 0 : index
    %c0_8 = arith.constant 0 : index
    %10 = arith.index_cast %9 : i32 to index
    %11 = vector.load %arg2[%c0_7, %c0_8, %10] : memref<1x2x1024xf32, #tpu.memory_space<vmem>>, vector<1x2x512xf32>
    %12 = vector.shape_cast %11 : vector<1x2x512xf32> to vector<2x512xf32>
    %13 = arith.truncf %12 : vector<2x512xf32> to vector<2x512xbf16>
    %cst = arith.constant dense<0.000000e+00> : vector<2x512xf32>
    %14 = tpu.matmul %0, %13, %cst {dimension_numbers = #tpu.dot_dimension_numbers<[1], [0], [0], [1], [0, 0, 1, 1], [], []>} : vector<2x2xbf16>, vector<2x512xbf16>, vector<2x512xf32> -> vector<2x512xf32>
    %15 = arith.addf %14, %4 : vector<2x512xf32>
    %cst_9 = arith.constant 5.000000e-01 : f32
    %16 = vector.broadcast %cst_9 : f32 to vector<2x512xf32>
    %17 = arith.mulf %16, %15 : vector<2x512xf32>
    %cst_10 = arith.constant 0.707106769 : f32
    %18 = vector.broadcast %cst_10 : f32 to vector<2x512xf32>
    %19 = arith.mulf %15, %18 : vector<2x512xf32>
    %20 = math.erf %19 : vector<2x512xf32>
    %cst_11 = arith.constant 1.000000e+00 : f32
    %21 = vector.broadcast %cst_11 : f32 to vector<2x512xf32>
    %22 = arith.addf %21, %20 : vector<2x512xf32>
    %23 = arith.mulf %17, %22 : vector<2x512xf32>
    %24 = arith.truncf %23 : vector<2x512xf32> to vector<2x512xbf16>
    %cst_12 = arith.constant dense<0.000000e+00> : vector<2x512xf32>
    %25 = tpu.matmul %1, %24, %cst_12 {dimension_numbers = #tpu.dot_dimension_numbers<[1], [0], [0], [1], [0, 0, 1, 1], [], []>} : vector<2x2xbf16>, vector<2x512xbf16>, vector<2x512xf32> -> vector<2x512xf32>
    %26 = arith.addf %25, %7 : vector<2x512xf32>
    %c0_13 = arith.constant 0 : index
    %c0_14 = arith.constant 0 : index
    %27 = arith.index_cast %9 : i32 to index
    %28 = vector.load %arg7[%c0_13, %c0_14, %27] : memref<1x2x1024xf32, #tpu.memory_space<vmem>>, vector<1x2x512xf32>
    %29 = vector.shape_cast %28 : vector<1x2x512xf32> to vector<2x512xf32>
    %30 = vector.shape_cast %26 : vector<2x512xf32> to vector<1x2x512xf32>
    tpu.vector_store %arg7[%c0_13, %c0_14, %27], %30 {strides = array<i32>} : memref<1x2x1024xf32, #tpu.memory_space<vmem>>, vector<1x2x512xf32>,
    %c1_i32 = arith.constant 1 : i32
    %c512_i32_15 = arith.constant 512 : i32
    %31 = arith.muli %c1_i32, %c512_i32_15 : i32
    %32 = tpu.assume_multiple %31, 512 : i32
    %c0_16 = arith.constant 0 : index
    %c0_17 = arith.constant 0 : index
    %33 = arith.index_cast %32 : i32 to index
    %34 = vector.load %arg2[%c0_16, %c0_17, %33] : memref<1x2x1024xf32, #tpu.memory_space<vmem>>, vector<1x2x512xf32>
    %35 = vector.shape_cast %34 : vector<1x2x512xf32> to vector<2x512xf32>
    %36 = arith.truncf %35 : vector<2x512xf32> to vector<2x512xbf16>
    %cst_18 = arith.constant dense<0.000000e+00> : vector<2x512xf32>
    %37 = tpu.matmul %0, %36, %cst_18 {dimension_numbers = #tpu.dot_dimension_numbers<[1], [0], [0], [1], [0, 0, 1, 1], [], []>} : vector<2x2xbf16>, vector<2x512xbf16>, vector<2x512xf32> -> vector<2x512xf32>
    %38 = arith.addf %37, %4 : vector<2x512xf32>
    %cst_19 = arith.constant 5.000000e-01 : f32
    %39 = vector.broadcast %cst_19 : f32 to vector<2x512xf32>
    %40 = arith.mulf %39, %38 : vector<2x512xf32>
    %cst_20 = arith.constant 0.707106769 : f32
    %41 = vector.broadcast %cst_20 : f32 to vector<2x512xf32>
    %42 = arith.mulf %38, %41 : vector<2x512xf32>
    %43 = math.erf %42 : vector<2x512xf32>
    %cst_21 = arith.constant 1.000000e+00 : f32
    %44 = vector.broadcast %cst_21 : f32 to vector<2x512xf32>
    %45 = arith.addf %44, %43 : vector<2x512xf32>
    %46 = arith.mulf %40, %45 : vector<2x512xf32>
    %47 = arith.truncf %46 : vector<2x512xf32> to vector<2x512xbf16>
    %cst_22 = arith.constant dense<0.000000e+00> : vector<2x512xf32>
    %48 = tpu.matmul %1, %47, %cst_22 {dimension_numbers = #tpu.dot_dimension_numbers<[1], [0], [0], [1], [0, 0, 1, 1], [], []>} : vector<2x2xbf16>, vector<2x512xbf16>, vector<2x512xf32> -> vector<2x512xf32>
    %49 = arith.addf %48, %7 : vector<2x512xf32>
    %c0_23 = arith.constant 0 : index
    %c0_24 = arith.constant 0 : index
    %50 = arith.index_cast %32 : i32 to index
    %51 = vector.load %arg7[%c0_23, %c0_24, %50] : memref<1x2x1024xf32, #tpu.memory_space<vmem>>, vector<1x2x512xf32>
    %52 = vector.shape_cast %51 : vector<1x2x512xf32> to vector<2x512xf32>
    %53 = vector.shape_cast %49 : vector<2x512xf32> to vector<1x2x512xf32>
    tpu.vector_store %arg7[%c0_23, %c0_24, %50], %53 {strides = array<i32>} : memref<1x2x1024xf32, #tpu.memory_space<vmem>>, vector<1x2x512xf32>,
    %c2_i32 = arith.constant 2 : i32
    return
  }
  func.func @transform_0(%arg0: i32, %arg1: i32) -> (i32, i32, i32) {
    %c0_i32 = arith.constant 0 : i32
    %c0_i32_0 = arith.constant 0 : i32
    return %arg0, %c0_i32, %arg1 : i32, i32, i32
  }
  func.func @transform_1(%arg0: i32, %arg1: i32) -> (i32, i32) {
    %c0_i32 = arith.constant 0 : i32
    %c0_i32_0 = arith.constant 0 : i32
    %c0_i32_1 = arith.constant 0 : i32
    return %c0_i32, %c0_i32_0 : i32, i32
  }
  func.func @transform_2(%arg0: i32, %arg1: i32) -> (i32, i32) {
    %c0_i32 = arith.constant 0 : i32
    %c0_i32_0 = arith.constant 0 : i32
    %c0_i32_1 = arith.constant 0 : i32
    return %c0_i32, %c0_i32_0 : i32, i32
  }
  func.func @transform_3(%arg0: i32, %arg1: i32) -> (i32, i32) {
    %c0_i32 = arith.constant 0 : i32
    %c0_i32_0 = arith.constant 0 : i32
    %c0_i32_1 = arith.constant 0 : i32
    return %c0_i32, %c0_i32_0 : i32, i32
  }
  func.func @transform_4(%arg0: i32, %arg1: i32) -> (i32, i32) {
    %c0_i32 = arith.constant 0 : i32
    %c0_i32_0 = arith.constant 0 : i32
    %c0_i32_1 = arith.constant 0 : i32
    return %c0_i32, %c0_i32_0 : i32, i32
  }
  func.func @transform_5(%arg0: i32, %arg1: i32) -> (i32, i32, i32) {
    %c0_i32 = arith.constant 0 : i32
    %c0_i32_0 = arith.constant 0 : i32
    return %arg0, %c0_i32, %arg1 : i32, i32, i32
  }
}

</mosaic_0001>

<bundles_post_ra>
// kernel: mlp_forward.1
= control target key start
LH: loop header
LB: loop body
LE: loop exit
PB: predicated region body
PF: predicated region fallthrough
CT: control target
= control target key end

     0   :  { %s1185_s18 = smov 0   ;;  %s1187_s19 = smov 0   ;;  %s1508_s0 = inlined_call_operand.vmem [shape: f32[2,2,1024], index: 0, kind: input, shape index: {}]   ;;  %s1509_s1 = inlined_call_operand.vmem [shape: bf16[2,2], index: 1, kind: input, shape index: {}]   ;;  %s1510_s2 = inlined_call_operand.vmem [shape: f32[2,1], index: 2, kind: input, shape index: {}]   ;;  %s1511_s3 = inlined_call_operand.vmem [shape: bf16[2,2], index: 3, kind: input, shape index: {}]   ;;  %s1512_s4 = inlined_call_operand.vmem [shape: f32[2,1], index: 4, kind: input, shape index: {}]   ;;  %s1513_s5 = inlined_call_operand.vmem [shape: f32[2,2,1024], index: 5, kind: output, shape index: {}]  }
   0x1   :  { %s1189_s20 = smov 0  }
   0x2 LB: > { %s27_s21 = sadd.s32 1, %s1148_s19  ;;  %p1053_p0 = scmp.ge.s32.totalorder %s1152_s20, 1  ;;  %s1152_s20 = sphi %s1189_s20, %s15_s20   ;;  %s1148_s19 = sphi %s1187_s19, %s1517_s19   ;;  %s1144_s18 = sphi %s1185_s18, %s1516_s18  }
   0x3   : > { %p29_p1 = scmp.ge.s32.totalorder %s27_s21, 2  ;;  %p208_p2 = scmp.lt.s32.totalorder %s1152_s20, 3 }
   0x5   : > { %s1519_s21 = smov (%p29_p1, %s27_s21), 0  ;;  %p209_p3 = pnand %p1053_p0, %p208_p2 }
   0x6   : > { %p245_p4 = scmp.lt.s32.totalorder (!%p209_p3), %s1144_s18, 1 }
   0x7   : > { %212 = sbr.rel (%p209_p3) target bundleno = 572 (0x23c), region = 40 }
   0xc   : > { %v1154_v0 = vmov 0   ;;  %v267_v1 = vld [vmem:[%s1510_s2] sm:$0x3]  ;;  %s1521_s18 = smov (!%p245_p4, %s1144_s18), 1  ;;  %vm298_vm0 = vcmask 1040384   ;;  %vm294_vm1 = vcmask 15360  }
   0xd   : > { %1113 = vset.pattern.permute.xlu0 %v1154_v0  ;;  %s1086_s24 = sshll.u32 %s1521_s18, 4  ;;  %v273_v3 = vld [vmem:[%s1512_s4] sm:$0x3] }
   0xe   : > { %270 = vperm.xlu0 %1113, %v267_v1   ;;  %s252_s27 = scalar_lea.vmem %s1508_s0, %s1086_s24  ;;  %v1224_v17 = vld [vmem:[%s1509_s1] sm:$0x1]  ;;  %s1394_s11 = scalar_lea.vmem %s1513_s5, %s1086_s24 }
   0xf   : > { %v279_v2 = vld [vmem:[%s252_s27] sm:$0xff]  ;;  %v1070_v4 = vld [vmem:[%s252_s27 + $0x8] sm:$0xff] }
  0x10   : > { %281 = vst [vmem:[#allocation1] ss:$4 sm:$0xff] %v279_v2 }
  0x16   : > { %276 = vperm.xlu0 %1113, %v273_v3  }
  0x17   : > { %v282_v5 = vld.sshfl [vmem:[#allocation1] sm:$0xff pattern:$0x73625140]  ;;  %v283_v6 = vld.sshfl [vmem:[#allocation1 + $0x8] sm:$0xff pattern:$0x73625140] }
  0x18   : > { %v290_v7 = vpack.c.bf16 %v282_v5, %v282_v5  ;;  %v291_v8 = vpack.c.bf16 %v283_v6, %v283_v6  ;;  %v284_v9 = vld.sshfl [vmem:[#allocation1 + $0x10] sm:$0xff pattern:$0x73625140]  ;;  %v285_v10 = vld.sshfl [vmem:[#allocation1 + $0x18] sm:$0xff pattern:$0x73625140] }
  0x19   : > { %v292_v11 = vpack.c.bf16 %v284_v9, %v284_v9  ;;  %v293_v12 = vpack.c.bf16 %v285_v10, %v285_v10  ;;  %628 = vst [vmem:[#allocation1] ss:$4 sm:$0xff] %v1070_v4 }
  0x1a   : > { %v300_v13 = vsel %vm298_vm0, %v290_v7, 0  ;;  %v303_v14 = vsel %vm298_vm0, %v291_v8, 0 }
  0x1b   : > { %318 = vmatpush.bf16.msra.mxu0 %v300_v13  ;;  %331 = vmatpush.bf16.msra.mxu1 %v303_v14  ;;  %v306_v15 = vsel %vm298_vm0, %v292_v11, 0  ;;  %v309_v16 = vsel %vm298_vm0, %v293_v12, 0 }
  0x1c   : > { %344 = vmatpush.bf16.msra.mxu2 %v306_v15  ;;  %357 = vmatpush.bf16.msra.mxu3 %v309_v16 }
  0x1e   : > { %1058 = vmatmul.msk.bf16.vlgmr.msra.gmra.mxu0 %vm294_vm1, %v1224_v17  ;;  %1059 = vmatmul.msk.bf16.vlgmr.msra.gmra.mxu1 %vm294_vm1, %v1224_v17 }
  0x1f   : > { %1060 = vmatmul.msk.bf16.vlgmr.msra.gmra.mxu2 %vm294_vm1, %v1224_v17  ;;  %1061 = vmatmul.msk.bf16.vlgmr.msra.gmra.mxu3 %vm294_vm1, %v1224_v17 }
  0x80   : > { %v1234_v18 = vpop.permute.xlu0 %270 }
  0x9b   : > { %v320_v19 = vpop.f32.mrf.mxu0  ;;  %v333_v20 = vpop.f32.mrf.mxu1 }
  0x9c   : > { %v1237_v21 = vadd.f32 %v320_v19, %v1234_v18  ;;  %v1240_v22 = vadd.f32 %v333_v20, %v1234_v18 }
  0x9e   : > { %v1243_v23 = vmul.f32 0.70710677, %v1237_v21  ;;  %v1246_v24 = vmul.f32 0.70710677, %v1240_v22 }
  0xa0   : > { %v371_v25 = vmul.f32 %v1243_v23, %v1243_v23  ;;  %v411_v26 = vmul.f32 %v1246_v24, %v1246_v24 }
  0xa2   : > { %v1252_v27 = vmin.f32 %v371_v25, 16.0  ;;  %v1254_v28 = vmin.f32 %v411_v26, 16.0  ;;  %v346_v29 = vpop.f32.mrf.mxu2  ;;  %v359_v30 = vpop.f32.mrf.mxu3 }
  0xa3   : > { %v1257_v31 = vadd.f32 %v346_v29, %v1234_v18  ;;  %v1260_v32 = vadd.f32 %v359_v30, %v1234_v18  ;;  %v322_v33 = vpop.f32.mrf.mxu0  ;;  %v335_v34 = vpop.f32.mrf.mxu1 }
  0xa4   : > { %v373_v35 = vmul.f32 2.1237322e-06, %v1252_v27  ;;  %v413_v36 = vmul.f32 2.1237322e-06, %v1254_v28  ;;  %v384_v37 = vmul.f32 3.8918573e-05, %v1252_v27 }
  0xa5   : > { %v1266_v38 = vmul.f32 0.70710677, %v1257_v31  ;;  %v1269_v39 = vmul.f32 0.70710677, %v1260_v32  ;;  %v424_v45 = vmul.f32 3.8918573e-05, %v1254_v28 }
  0xa6   : > { %v374_v40 = vadd.f32 0.00028619796, %v373_v35  ;;  %v414_v41 = vadd.f32 0.00028619796, %v413_v36  ;;  %v385_v42 = vadd.f32 0.001143296, %v384_v37 }
  0xa7   : > { %v451_v43 = vmul.f32 %v1266_v38, %v1266_v38  ;;  %v491_v44 = vmul.f32 %v1269_v39, %v1269_v39  ;;  %v425_v51 = vadd.f32 0.001143296, %v424_v45 }
  0xa8   : > { %v375_v46 = vmul.f32 %v374_v40, %v1252_v27  ;;  %v415_v47 = vmul.f32 %v414_v41, %v1254_v28  ;;  %v386_v48 = vmul.f32 %v385_v42, %v1252_v27 }
  0xa9   : > { %v1279_v49 = vmin.f32 %v451_v43, 16.0  ;;  %v1281_v50 = vmin.f32 %v491_v44, 16.0  ;;  %v426_v59 = vmul.f32 %v425_v51, %v1254_v28 }
  0xaa   : > { %v376_v52 = vadd.f32 0.0036580483, %v375_v46  ;;  %v416_v53 = vadd.f32 0.0036580483, %v415_v47  ;;  %v348_v54 = vpop.f32.mrf.mxu2  ;;  %v361_v55 = vpop.f32.mrf.mxu3  ;;  %v387_v56 = vadd.f32 0.014752088, %v386_v48 }
  0xab   : > { %v453_v57 = vmul.f32 2.1237322e-06, %v1279_v49  ;;  %v493_v58 = vmul.f32 2.1237322e-06, %v1281_v50  ;;  %v464_v60 = vmul.f32 3.8918573e-05, %v1279_v49 }
  0xac   : > { %v377_v61 = vmul.f32 %v376_v52, %v1252_v27  ;;  %v388_v62 = vmul.f32 %v387_v56, %v1252_v27  ;;  %v504_v63 = vmul.f32 3.8918573e-05, %v1281_v50  ;;  %v427_v2 = vadd.f32 0.014752088, %v426_v59 }
  0xad   : > { %v454_v0 = vadd.f32 0.00028619796, %v453_v57  ;;  %v494_v1 = vadd.f32 0.00028619796, %v493_v58  ;;  %v417_v4 = vmul.f32 %v416_v53, %v1254_v28  ;;  %v465_v7 = vadd.f32 0.001143296, %v464_v60 }
  0xae   : > { %v389_v3 = vadd.f32 0.112945676, %v388_v62  ;;  %v428_v6 = vmul.f32 %v427_v2, %v1254_v28  ;;  %v378_v8 = vadd.f32 0.05243302, %v377_v61  ;;  %v505_v11 = vadd.f32 0.001143296, %v504_v63 }
  0xaf   : > { %v455_v5 = vmul.f32 %v454_v0, %v1279_v49  ;;  %v495_v9 = vmul.f32 %v494_v1, %v1281_v50  ;;  %v466_v14 = vmul.f32 %v465_v7, %v1279_v49  ;;  %v418_v19 = vadd.f32 0.05243302, %v417_v4 }
  0xb0   : > { %v390_v10 = vmul.f32 %v389_v3, %v1252_v27  ;;  %v429_v13 = vadd.f32 0.112945676, %v428_v6  ;;  %v506_v16 = vmul.f32 %v505_v11, %v1281_v50  ;;  %v379_v26 = vmul.f32 %v378_v8, %v1252_v27 }
  0xb1   : > { %v456_v12 = vadd.f32 0.0036580483, %v455_v5  ;;  %v467_v25 = vadd.f32 0.014752088, %v466_v14  ;;  %v496_v29 = vadd.f32 0.0036580483, %v495_v9  ;;  %v419_v41 = vmul.f32 %v418_v19, %v1254_v28 }
  0xb2   : > { %v391_v15 = vadd.f32 0.4994258, %v390_v10  ;;  %v430_v20 = vmul.f32 %v429_v13, %v1254_v28  ;;  %v507_v33 = vadd.f32 0.014752088, %v506_v16  ;;  %v380_v44 = vadd.f32 0.18741608, %v379_v26 }
  0xb3   : > { %v457_v34 = vmul.f32 %v456_v12, %v1279_v49  ;;  %v468_v36 = vmul.f32 %v467_v25, %v1279_v49  ;;  %v497_v45 = vmul.f32 %v496_v29, %v1281_v50  ;;  %v420_v52 = vadd.f32 0.18741608, %v419_v41 }
  0xb4   : > { %v392_v30 = vmul.f32 %v391_v15, %v1252_v27  ;;  %v431_v35 = vadd.f32 0.4994258, %v430_v20  ;;  %v508_v40 = vmul.f32 %v507_v33, %v1281_v50  ;;  %v381_v54 = vmul.f32 %v380_v44, %v1252_v27 }
  0xb5   : > { %v469_v43 = vadd.f32 0.112945676, %v468_v36  ;;  %v458_v46 = vadd.f32 0.05243302, %v457_v34  ;;  %v498_v55 = vadd.f32 0.05243302, %v497_v45  ;;  %v421_v60 = vmul.f32 %v420_v52, %v1254_v28 }
  0xb6   : > { %v393_v37 = vadd.f32 1.0, %v392_v30  ;;  %v432_v42 = vmul.f32 %v431_v35, %v1254_v28  ;;  %v509_v51 = vadd.f32 0.112945676, %v508_v40  ;;  %v382_v62 = vadd.f32 1.1283791, %v381_v54 }
  0xb7   : > { %v470_v47 = vmul.f32 %v469_v43, %v1279_v49  ;;  %v459_v56 = vmul.f32 %v458_v46, %v1279_v49  ;;  %v499_v63 = vmul.f32 %v498_v55, %v1281_v50  ;;  %v422_v9 = vadd.f32 1.1283791, %v421_v60  ;;  %v629_v35 = vld.sshfl [vmem:[#allocation1] sm:$0xff pattern:$0x73625140] }
  0xb8   : > { %1114 = vrcp.f32 %v393_v37  ;;  %v433_v48 = vadd.f32 1.0, %v432_v42  ;;  %v510_v59 = vmul.f32 %v509_v51, %v1281_v50  ;;  %v403_v4 = vand.u32 2147483647, %v393_v37 }
  0xb9   : > { %v471_v53 = vadd.f32 0.4994258, %v470_v47  ;;  %v460_v2 = vadd.f32 0.18741608, %v459_v56  ;;  %v405_v5 = vand.u32 2147483648, %v393_v37  ;;  %v383_v28 = vmul.f32 %v382_v62, %v1243_v23 }
  0xba   : > { %1116 = vrcp.f32 %v433_v48  ;;  %v511_v1 = vadd.f32 0.4994258, %v510_v59  ;;  %v500_v10 = vadd.f32 0.18741608, %v499_v63  ;;  %vm399_vm3 = vweird.f32 %v393_v37 }
  0xbb   : > { %v472_v57 = vmul.f32 %v471_v53, %v1279_v49  ;;  %v461_v11 = vmul.f32 %v460_v2, %v1279_v49  ;;  %vm404_vm5 = vcmp.eq.f32.partialorder %v403_v4, 8.507059e+37  ;;  %v406_v15 = vor.u32 1.1754944e-38, %v405_v5 }
  0xbc   : > { %v512_v8 = vmul.f32 %v511_v1, %v1281_v50  ;;  %v443_v16 = vand.u32 2147483647, %v433_v48  ;;  %v445_v19 = vand.u32 2147483648, %v433_v48  ;;  %v363_v26 = vmul.f32 0.5, %v1237_v21 }
  0xbd   : > { %v1313_v0 = vadd.f32 1.0, %v472_v57  ;;  %v423_v29 = vmul.f32 %v422_v9, %v1246_v24  ;;  %vm439_vm7 = vweird.f32 %v433_v48  ;;  %v462_v36 = vadd.f32 1.1283791, %v461_v11 }
  0xbe   : > { %v1115_v58 = vpop.eup %1114  ;;  %v1319_v14 = vadd.f32 1.0, %v512_v8  ;;  %vm444_vm9 = vcmp.eq.f32.partialorder %v443_v16, 8.507059e+37  ;;  %v446_v40 = vor.u32 1.1754944e-38, %v445_v19  ;;  %v364_v24 = vmul.f32 0.5, %v1240_v22 }
  0xbf   : > { %v395_v61 = vmul.f32 %v1115_v58, %v393_v37  ;;  %1118 = vrcp.f32 %v1313_v0  ;;  %vm400_vm2 = vweird.f32 %v1115_v58  ;;  %v501_v37 = vmul.f32 %v500_v10, %v1281_v50  ;;  %v630_v22 = vld.sshfl [vmem:[#allocation1 + $0x8] sm:$0xff pattern:$0x73625140]  ;;  %v631_v10 = vld.sshfl [vmem:[#allocation1 + $0x10] sm:$0xff pattern:$0x73625140] }
  0xc0   : > { %v1117_v3 = vpop.eup %1116  ;;  %vm401_vm4 = vmor %vm399_vm3, %vm400_vm2  ;;  %1120 = vrcp.f32 %v1319_v14  ;;  %v483_v21 = vand.u32 2147483647, %v1313_v0  ;;  %v485_v45 = vand.u32 2147483648, %v1313_v0  ;;  %v637_v46 = vpack.c.bf16 %v629_v35, %v629_v35 }
  0xc1   : > { %v396_v27 = vsub.f32 1.0, %v395_v61  ;;  %v435_v7 = vmul.f32 %v1117_v3, %v433_v48  ;;  %vm440_vm6 = vweird.f32 %v1117_v3  ;;  %v463_v50 = vmul.f32 %v462_v36, %v1266_v38 }
  0xc2   : > { %vm441_vm8 = vmor %vm439_vm7, %vm440_vm6  ;;  %v502_v53 = vadd.f32 1.1283791, %v501_v37  ;;  %vm479_vm11 = vweird.f32 %v1313_v0  ;;  %vm484_vm12 = vcmp.eq.f32.partialorder %v483_v21, 8.507059e+37  ;;  %v523_v60 = vand.u32 2147483647, %v1319_v14 }
  0xc3   : > { %v397_v6 = vmul.f32 %v1115_v58, %v396_v27  ;;  %v436_v13 = vsub.f32 1.0, %v435_v7  ;;  %v525_v61 = vand.u32 2147483648, %v1319_v14  ;;  %v642_v1 = vsel %vm298_vm0, %v637_v46, 0 }
  0xc4   : > { %v638_v27 = vpack.c.bf16 %v630_v22, %v630_v22  ;;  %vm519_vm15 = vweird.f32 %v1319_v14  ;;  %v503_v11 = vmul.f32 %v502_v53, %v1269_v39  ;;  %vm524_vm3 = vcmp.eq.f32.partialorder %v523_v60, 8.507059e+37  ;;  %v632_v39 = vld.sshfl [vmem:[#allocation1 + $0x18] sm:$0xff pattern:$0x73625140] }
  0xc5   : > { %v398_v12 = vadd.f32 %v1115_v58, %v397_v6  ;;  %v437_v25 = vmul.f32 %v1117_v3, %v436_v13  ;;  %v1119_v23 = vpop.eup %1118  ;;  %v1339_v6 = vld [vmem:[%s1511_s3] sm:$0x1]  ;;  %v526_v9 = vor.u32 1.1754944e-38, %v525_v61  ;;  %vm621_vm6 = vcmask 1043456  }
  0xc6   : > { %v475_v34 = vmul.f32 %v1119_v23, %v1313_v0  ;;  %v1121_v47 = vpop.eup %1120  ;;  %vm480_vm10 = vweird.f32 %v1119_v23  ;;  %v645_v13 = vsel %vm298_vm0, %v638_v27, 0 }
  0xc7   : > { %v402_v20 = vsel %vm401_vm4, %v1115_v58, %v398_v12  ;;  %v438_v33 = vadd.f32 %v1117_v3, %v437_v25  ;;  %v515_v54 = vmul.f32 %v1121_v47, %v1319_v14  ;;  %vm481_vm13 = vmor %vm479_vm11, %vm480_vm10  ;;  %v486_v58 = vor.u32 1.1754944e-38, %v485_v45 }
  0xc8   : > { %v407_v49 = vsel %vm404_vm5, %v406_v15, %v402_v20  ;;  %v476_v43 = vsub.f32 1.0, %v475_v34  ;;  %vm520_vm14 = vweird.f32 %v1121_v47  ;;  %v365_v15 = vmul.f32 0.5, %v1257_v31 }
  0xc9   : > { %v408_v30 = vmul.f32 %v407_v49, %v383_v28  ;;  %v442_v42 = vsel %vm441_vm8, %v1117_v3, %v438_v33  ;;  %v516_v59 = vsub.f32 1.0, %v515_v54  ;;  %vm521_vm2 = vmor %vm519_vm15, %vm520_vm14  ;;  %v639_v25 = vpack.c.bf16 %v631_v10, %v631_v10 }
  0xca   : > { %v447_v44 = vsel %vm444_vm9, %v446_v40, %v442_v42  ;;  %v477_v52 = vmul.f32 %v1119_v23, %v476_v43  ;;  %v366_v31 = vmul.f32 0.5, %v1260_v32  ;;  %v640_v34 = vpack.c.bf16 %v632_v39, %v632_v39 }
  0xcb   : > { %v1062_v41 = vclamps-f32 %v408_v30, 1.0  ;;  %v448_v51 = vmul.f32 %v447_v44, %v423_v29  ;;  %v517_v2 = vmul.f32 %v1121_v47, %v516_v59  ;;  %v648_v30 = vsel %vm298_vm0, %v639_v25, 0  ;;  %v1367_v44 = vpop.permute.xlu0 %276 }
  0xcc   : > { %v478_v57 = vadd.f32 %v1119_v23, %v477_v52  ;;  %v651_v37 = vsel %vm298_vm0, %v640_v34, 0  ;;  %vm617_vm4 = vcmask 1041408   ;;  %vm619_vm5 = vcmask 1045508  }
  0xcd   : > { %v531_v48 = vadd.f32 1.0, %v1062_v41  ;;  %v1063_v56 = vclamps-f32 %v448_v51, 1.0  ;;  %v518_v7 = vadd.f32 %v1121_v47, %v517_v2 }
  0xce   : > { %v482_v38 = vsel %vm481_vm13, %v1119_v23, %v478_v57 }
  0xcf   : > { %v535_v55 = vmul.f32 %v531_v48, %v363_v26  ;;  %v532_v63 = vadd.f32 1.0, %v1063_v56  ;;  %v487_v0 = vsel %vm484_vm12, %v486_v58, %v482_v38  ;;  %v522_v12 = vsel %vm521_vm2, %v1121_v47, %v518_v7 }
  0xd0   : > { %v488_v5 = vmul.f32 %v487_v0, %v463_v50  ;;  %v527_v19 = vsel %vm524_vm3, %v526_v9, %v522_v12 }
  0xd1   : > { %v539_v62 = vpack.c.bf16 %v535_v55, %v535_v55  ;;  %v536_v4 = vmul.f32 %v532_v63, %v364_v24  ;;  %v528_v20 = vmul.f32 %v527_v19, %v503_v11 }
  0xd2   : > { %v1064_v28 = vclamps-f32 %v488_v5, 1.0 }
  0xd3   : > { %v547_v3 = vsel %vm298_vm0, %v539_v62, 0  ;;  %v540_v8 = vpack.c.bf16 %v536_v4, %v536_v4  ;;  %v1065_v26 = vclamps-f32 %v528_v20, 1.0 }
  0xd4   : > { %565 = vmatpush.bf16.msrb.mxu0 %v547_v3  ;;  %v533_v14 = vadd.f32 1.0, %v1064_v28 }
  0xd5   : > { %v550_v16 = vsel %vm298_vm0, %v540_v8, 0  ;;  %v534_v49 = vadd.f32 1.0, %v1065_v26 }
  0xd6   : > { %578 = vmatpush.bf16.msrb.mxu1 %v550_v16  ;;  %v537_v23 = vmul.f32 %v533_v14, %v365_v15 }
  0xd7   : > { %1066 = vmatmul.msk.bf16.vlgmr.msrb.gmra.mxu0 %vm294_vm1, %v1339_v6  ;;  %v538_v35 = vmul.f32 %v534_v49, %v366_v31 }
  0xd8   : > { %660 = vmatpush.bf16.msra.mxu0 %v642_v1  ;;  %v541_v29 = vpack.c.bf16 %v537_v23, %v537_v23 }
  0xd9   : > { %1067 = vmatmul.msk.bf16.vlgmr.msrb.gmra.mxu1 %vm294_vm1, %v1339_v6  ;;  %v542_v36 = vpack.c.bf16 %v538_v35, %v538_v35 }
  0xda   : > { %673 = vmatpush.bf16.msra.mxu1 %v645_v13  ;;  %v553_v33 = vsel %vm298_vm0, %v541_v29, 0 }
  0xdb   : > { %591 = vmatpush.bf16.msrb.mxu2 %v553_v33  ;;  %v556_v40 = vsel %vm298_vm0, %v542_v36, 0 }
  0xdc   : > { %604 = vmatpush.bf16.msrb.mxu3 %v556_v40 }
  0xde   : > { %1068 = vmatmul.msk.bf16.vlgmr.msrb.gmra.mxu2 %vm294_vm1, %v1339_v6 }
  0xdf   : > { %686 = vmatpush.bf16.msra.mxu2 %v648_v30  ;;  %1069 = vmatmul.msk.bf16.vlgmr.msrb.gmra.mxu3 %vm294_vm1, %v1339_v6 }
  0xe0   : > { %699 = vmatpush.bf16.msra.mxu3 %v651_v37 }
  0xe7   : > { %1071 = vmatmul.msk.bf16.vlgmr.msra.gmra.mxu0 %vm294_vm1, %v1224_v17 }
  0xe9   : > { %1072 = vmatmul.msk.bf16.vlgmr.msra.gmra.mxu1 %vm294_vm1, %v1224_v17 }
  0xee   : > { %1073 = vmatmul.msk.bf16.vlgmr.msra.gmra.mxu2 %vm294_vm1, %v1224_v17 }
  0xef   : > { %1074 = vmatmul.msk.bf16.vlgmr.msra.gmra.mxu3 %vm294_vm1, %v1224_v17 }
 0x154   : > { %v567_v32 = vpop.f32.mrf.mxu0 }
 0x155   : > { %v568_v22 = vadd.f32 %v567_v32, %v1367_v44 }
 0x156   : > { %v580_v41 = vpop.f32.mrf.mxu1 }
 0x157   : > { %v581_v46 = vadd.f32 %v580_v41, %v1367_v44 }
 0x159   : > { %v614_v53 = vrot.slane %v581_v46, 6 }
 0x15b   : > { %v618_v38 = vsel %vm617_vm4, %v568_v22, %v614_v53 }
 0x15c   : > { %v569_v42 = vpop.f32.mrf.mxu0 }
 0x15e   : > { %v582_v43 = vpop.f32.mrf.mxu1 }
 0x161   : > { %v593_v21 = vpop.f32.mrf.mxu2 }
 0x162   : > { %v594_v47 = vadd.f32 %v593_v21, %v1367_v44  ;;  %v606_v17 = vpop.f32.mrf.mxu3 }
 0x163   : > { %v607_v55 = vadd.f32 %v606_v17, %v1367_v44 }
 0x164   : > { %v662_v24 = vpop.f32.mrf.mxu0  ;;  %v615_v54 = vrot.slane %v594_v47, 4 }
 0x165   : > { %v1370_v45 = vadd.f32 %v662_v24, %v1234_v18  ;;  %v616_v58 = vrot.slane %v607_v55, 2 }
 0x166   : > { %v675_v51 = vpop.f32.mrf.mxu1 }
 0x167   : > { %v1375_v48 = vmul.f32 0.70710677, %v1370_v45  ;;  %v1380_v50 = vadd.f32 %v675_v51, %v1234_v18  ;;  %v620_v1 = vsel %vm619_vm5, %v615_v54, %v616_v58 }
 0x168   : > { %v622_v0 = vsel %vm621_vm6, %v618_v38, %v620_v1 }
 0x169   : > { %v713_v52 = vmul.f32 %v1375_v48, %v1375_v48  ;;  %v1386_v57 = vmul.f32 0.70710677, %v1380_v50  ;;  %v595_v59 = vpop.f32.mrf.mxu2  ;;  %624 = vst [vmem:[%s1394_s11] sm:$0xff] %v622_v0 }
 0x16a   : > { %v608_v9 = vpop.f32.mrf.mxu3 }
 0x16b   : > { %v1383_v56 = vmin.f32 %v713_v52, 16.0  ;;  %v753_v63 = vmul.f32 %v1386_v57, %v1386_v57 }
 0x16c   : > { %v664_v60 = vpop.f32.mrf.mxu0 }
 0x16d   : > { %v715_v61 = vmul.f32 2.1237322e-06, %v1383_v56  ;;  %v726_v62 = vmul.f32 3.8918573e-05, %v1383_v56  ;;  %v1403_v3 = vmin.f32 %v753_v63, 16.0 }
 0x16e   : > { %v677_v4 = vpop.f32.mrf.mxu1 }
 0x16f   : > { %v716_v2 = vadd.f32 0.00028619796, %v715_v61  ;;  %v727_v27 = vadd.f32 0.001143296, %v726_v62  ;;  %v755_v8 = vmul.f32 2.1237322e-06, %v1403_v3 }
 0x170   : > { %v766_v28 = vmul.f32 3.8918573e-05, %v1403_v3 }
 0x171   : > { %v717_v5 = vmul.f32 %v716_v2, %v1383_v56  ;;  %v728_v7 = vmul.f32 %v727_v27, %v1383_v56  ;;  %v756_v12 = vadd.f32 0.00028619796, %v755_v8  ;;  %v688_v15 = vpop.f32.mrf.mxu2 }
 0x172   : > { %v767_v13 = vadd.f32 0.001143296, %v766_v28  ;;  %v1414_v20 = vadd.f32 %v688_v15, %v1234_v18  ;;  %v701_v30 = vpop.f32.mrf.mxu3 }
 0x173   : > { %v718_v10 = vadd.f32 0.0036580483, %v717_v5  ;;  %v729_v11 = vadd.f32 0.014752088, %v728_v7  ;;  %v757_v19 = vmul.f32 %v756_v12, %v1403_v3  ;;  %v1425_v35 = vadd.f32 %v701_v30, %v1234_v18 }
 0x174   : > { %v768_v25 = vmul.f32 %v767_v13, %v1403_v3  ;;  %v1418_v31 = vmul.f32 0.70710677, %v1414_v20 }
 0x175   : > { %v719_v16 = vmul.f32 %v718_v10, %v1383_v56  ;;  %v730_v14 = vmul.f32 %v729_v11, %v1383_v56  ;;  %v758_v39 = vadd.f32 0.0036580483, %v757_v19  ;;  %v1432_v42 = vmul.f32 0.70710677, %v1425_v35 }
 0x176   : > { %v769_v29 = vadd.f32 0.014752088, %v768_v25  ;;  %v793_v34 = vmul.f32 %v1418_v31, %v1418_v31 }
 0x177   : > { %v720_v23 = vadd.f32 0.05243302, %v719_v16  ;;  %v731_v26 = vadd.f32 0.112945676, %v730_v14  ;;  %v759_v40 = vmul.f32 %v758_v39, %v1403_v3  ;;  %v833_v52 = vmul.f32 %v1432_v42, %v1432_v42 }
 0x178   : > { %v770_v33 = vmul.f32 %v769_v29, %v1403_v3  ;;  %v1429_v41 = vmin.f32 %v793_v34, 16.0 }
 0x179   : > { %v732_v49 = vmul.f32 %v731_v26, %v1383_v56  ;;  %v721_v36 = vmul.f32 %v720_v23, %v1383_v56  ;;  %v690_v43 = vpop.f32.mrf.mxu2  ;;  %v760_v17 = vadd.f32 0.05243302, %v759_v40  ;;  %v1445_v63 = vmin.f32 %v833_v52, 16.0 }
 0x17a   : > { %v771_v32 = vadd.f32 0.112945676, %v770_v33  ;;  %v795_v46 = vmul.f32 2.1237322e-06, %v1429_v41  ;;  %v806_v18 = vmul.f32 3.8918573e-05, %v1429_v41  ;;  %v703_v22 = vpop.f32.mrf.mxu3 }
 0x17b   : > { %v733_v37 = vadd.f32 0.4994258, %v732_v49  ;;  %v722_v47 = vadd.f32 0.18741608, %v721_v36  ;;  %v761_v61 = vmul.f32 %v760_v17, %v1403_v3  ;;  %v835_v0 = vmul.f32 2.1237322e-06, %v1445_v63 }
 0x17c   : > { %v772_v24 = vmul.f32 %v771_v32, %v1403_v3  ;;  %v796_v54 = vadd.f32 0.00028619796, %v795_v46  ;;  %v807_v55 = vadd.f32 0.001143296, %v806_v18  ;;  %v846_v2 = vmul.f32 3.8918573e-05, %v1445_v63 }
 0x17d   : > { %v734_v21 = vmul.f32 %v733_v37, %v1383_v56  ;;  %v723_v60 = vmul.f32 %v722_v47, %v1383_v56  ;;  %v762_v7 = vadd.f32 0.18741608, %v761_v61  ;;  %v836_v56 = vadd.f32 0.00028619796, %v835_v0 }
 0x17e   : > { %v773_v53 = vadd.f32 0.4994258, %v772_v24  ;;  %v797_v59 = vmul.f32 %v796_v54, %v1429_v41  ;;  %v808_v62 = vmul.f32 %v807_v55, %v1429_v41  ;;  %v847_v9 = vadd.f32 0.001143296, %v846_v2 }
 0x17f   : > { %v735_v51 = vadd.f32 1.0, %v734_v21  ;;  %v724_v5 = vadd.f32 1.1283791, %v723_v60  ;;  %v837_v12 = vmul.f32 %v836_v56, %v1445_v63  ;;  %v763_v25 = vmul.f32 %v762_v7, %v1403_v3 }
 0x180   : > { %v774_v58 = vmul.f32 %v773_v53, %v1403_v3  ;;  %v809_v1 = vadd.f32 0.014752088, %v808_v62  ;;  %v798_v27 = vadd.f32 0.0036580483, %v797_v59  ;;  %v848_v14 = vmul.f32 %v847_v9, %v1445_v63 }
 0x181   : > { %1122 = vrcp.f32 %v735_v51  ;;  %v745_v10 = vand.u32 2147483647, %v735_v51  ;;  %v747_v15 = vand.u32 2147483648, %v735_v51  ;;  %v725_v19 = vmul.f32 %v724_v5, %v1375_v48 }
 0x182   : > { %v775_v38 = vadd.f32 1.0, %v774_v58  ;;  %v810_v8 = vmul.f32 %v809_v1, %v1429_v41  ;;  %v799_v16 = vmul.f32 %v798_v27, %v1429_v41  ;;  %vm741_vm7 = vweird.f32 %v735_v51 }
 0x183   : > { %v849_v29 = vadd.f32 0.014752088, %v848_v14  ;;  %vm1456_vm9 = vcmp.eq.f32.partialorder %v745_v10, 8.507059e+37  ;;  %v838_v34 = vadd.f32 0.0036580483, %v837_v12  ;;  %v748_v37 = vor.u32 1.1754944e-38, %v747_v15 }
 0x184   : > { %1124 = vrcp.f32 %v775_v38  ;;  %v811_v11 = vadd.f32 0.112945676, %v810_v8  ;;  %v800_v40 = vadd.f32 0.05243302, %v799_v16  ;;  %v764_v3 = vadd.f32 1.1283791, %v763_v25 }
 0x185   : > { %v850_v48 = vmul.f32 %v849_v29, %v1445_v63  ;;  %v785_v43 = vand.u32 2147483647, %v775_v38  ;;  %v787_v46 = vand.u32 2147483648, %v775_v38  ;;  %v839_v52 = vmul.f32 %v838_v34, %v1445_v63 }
 0x186   : > { %v812_v23 = vmul.f32 %v811_v11, %v1429_v41  ;;  %v801_v54 = vmul.f32 %v800_v40, %v1429_v41  ;;  %vm781_vm12 = vweird.f32 %v775_v38  ;;  %v765_v59 = vmul.f32 %v764_v3, %v1386_v57 }
 0x187   : > { %v1123_v4 = vpop.eup %1122  ;;  %v851_v18 = vadd.f32 0.112945676, %v850_v48  ;;  %v788_v60 = vor.u32 1.1754944e-38, %v787_v46  ;;  %vm786_vm14 = vcmp.eq.f32.partialorder %v785_v43, 8.507059e+37  ;;  %v840_v62 = vadd.f32 0.05243302, %v839_v52 }
 0x188   : > { %v737_v28 = vmul.f32 %v1123_v4, %v735_v51  ;;  %vm742_vm8 = vweird.f32 %v1123_v4  ;;  %v813_v33 = vadd.f32 0.4994258, %v812_v23  ;;  %v705_v0 = vmul.f32 0.5, %v1370_v45 }
 0x189   : > { %vm743_vm10 = vmor %vm741_vm7, %vm742_vm8  ;;  %v852_v55 = vmul.f32 %v851_v18, %v1445_v63  ;;  %v841_v57 = vmul.f32 %v840_v62, %v1445_v63  ;;  %v706_v12 = vmul.f32 0.5, %v1380_v50 }
 0x18a   : > { %v738_v13 = vsub.f32 1.0, %v737_v28  ;;  %v1125_v26 = vpop.eup %1124  ;;  %v814_v21 = vmul.f32 %v813_v33, %v1429_v41 }
 0x18b   : > { %v777_v30 = vmul.f32 %v1125_v26, %v775_v38  ;;  %vm782_vm11 = vweird.f32 %v1125_v26  ;;  %v853_v1 = vadd.f32 0.4994258, %v852_v55 }
 0x18c   : > { %v739_v39 = vmul.f32 %v1123_v4, %v738_v13  ;;  %v815_v17 = vadd.f32 1.0, %v814_v21  ;;  %vm783_vm13 = vmor %vm781_vm12, %vm782_vm11 }
 0x18d   : > { %v778_v32 = vsub.f32 1.0, %v777_v30  ;;  %v854_v7 = vmul.f32 %v853_v1, %v1445_v63 }
 0x18e   : > { %v740_v36 = vadd.f32 %v1123_v4, %v739_v39  ;;  %1126 = vrcp.f32 %v815_v17  ;;  %v827_v14 = vand.u32 2147483648, %v815_v17  ;;  %vm821_vm2 = vweird.f32 %v815_v17 }
 0x18f   : > { %v779_v51 = vmul.f32 %v1125_v26, %v778_v32  ;;  %v855_v28 = vadd.f32 1.0, %v854_v7 }
 0x190   : > { %v744_v24 = vsel %vm743_vm10, %v1123_v4, %v740_v36  ;;  %v802_v4 = vadd.f32 0.18741608, %v801_v54 }
 0x191   : > { %v749_v47 = vsel %vm1456_vm9, %v748_v37, %v744_v24  ;;  %v780_v22 = vadd.f32 %v1125_v26, %v779_v51  ;;  %1128 = vrcp.f32 %v855_v28  ;;  %v867_v32 = vand.u32 2147483648, %v855_v28 }
 0x192   : > { %v750_v53 = vmul.f32 %v749_v47, %v725_v19  ;;  %v803_v10 = vmul.f32 %v802_v4, %v1429_v41  ;;  %v842_v19 = vadd.f32 0.18741608, %v841_v57  ;;  %v828_v41 = vor.u32 1.1754944e-38, %v827_v14 }
 0x193   : > { %v784_v61 = vsel %vm783_vm13, %v1125_v26, %v780_v22  ;;  %v825_v26 = vand.u32 2147483647, %v815_v17  ;;  %v707_v24 = vmul.f32 0.5, %v1414_v20  ;;  %vm861_vm9 = vweird.f32 %v855_v28 }
 0x194   : > { %v1075_v58 = vclamps-f32 %v750_v53, 1.0  ;;  %v789_v27 = vsel %vm786_vm14, %v788_v60, %v784_v61  ;;  %v1127_v8 = vpop.eup %1126  ;;  %v804_v25 = vadd.f32 1.1283791, %v803_v10  ;;  %v843_v49 = vmul.f32 %v842_v19, %v1445_v63 }
 0x195   : > { %v790_v5 = vmul.f32 %v789_v27, %v765_v59  ;;  %v817_v11 = vmul.f32 %v1127_v8, %v815_v17  ;;  %vm822_vm15 = vweird.f32 %v1127_v8  ;;  %vm826_vm7 = vcmp.eq.f32.partialorder %v825_v26, 8.507059e+37 }
 0x196   : > { %v873_v2 = vadd.f32 1.0, %v1075_v58  ;;  %vm823_vm3 = vmor %vm821_vm2, %vm822_vm15  ;;  %v805_v33 = vmul.f32 %v804_v25, %v1418_v31  ;;  %v844_v3 = vadd.f32 1.1283791, %v843_v49  ;;  %v865_v63 = vand.u32 2147483647, %v855_v28 }
 0x197   : > { %v1076_v56 = vclamps-f32 %v790_v5, 1.0  ;;  %v818_v45 = vsub.f32 1.0, %v817_v11  ;;  %v1129_v50 = vpop.eup %1128  ;;  %v868_v18 = vor.u32 1.1754944e-38, %v867_v32  ;;  %v708_v58 = vmul.f32 0.5, %v1425_v35 }
 0x198   : > { %v877_v38 = vmul.f32 %v873_v2, %v705_v0  ;;  %v857_v36 = vmul.f32 %v1129_v50, %v855_v28  ;;  %vm862_vm8 = vweird.f32 %v1129_v50  ;;  %v845_v51 = vmul.f32 %v844_v3, %v1432_v42 }
 0x199   : > { %v874_v13 = vadd.f32 1.0, %v1076_v56  ;;  %v819_v23 = vmul.f32 %v1127_v8, %v818_v45  ;;  %vm863_vm10 = vmor %vm861_vm9, %vm862_vm8  ;;  %vm866_vm11 = vcmp.eq.f32.partialorder %v865_v63, 8.507059e+37 }
 0x19a   : > { %v881_v9 = vpack.c.bf16 %v877_v38, %v877_v38  ;;  %v858_v48 = vsub.f32 1.0, %v857_v36 }
 0x19b   : > { %v878_v16 = vmul.f32 %v874_v13, %v706_v12  ;;  %v820_v29 = vadd.f32 %v1127_v8, %v819_v23 }
 0x19c   : > { %v886_v15 = vsel %vm298_vm0, %v881_v9, 0  ;;  %v859_v21 = vmul.f32 %v1129_v50, %v858_v48 }
 0x19d   : > { %904 = vmatpush.bf16.msrb.mxu0 %v886_v15  ;;  %v882_v39 = vpack.c.bf16 %v878_v16, %v878_v16  ;;  %v824_v34 = vsel %vm823_vm3, %v1127_v8, %v820_v29 }
 0x19e   : > { %v829_v37 = vsel %vm826_vm7, %v828_v41, %v824_v34  ;;  %v860_v31 = vadd.f32 %v1129_v50, %v859_v21 }
 0x19f   : > { %v889_v30 = vsel %vm298_vm0, %v882_v39, 0  ;;  %v830_v40 = vmul.f32 %v829_v37, %v805_v33 }
 0x1a0   : > { %1079 = vmatmul.msk.bf16.vlgmr.msrb.gmra.mxu0 %vm294_vm1, %v1339_v6  ;;  %917 = vmatpush.bf16.msrb.mxu1 %v889_v30  ;;  %v864_v17 = vsel %vm863_vm10, %v1129_v50, %v860_v31 }
 0x1a1   : > { %v1077_v43 = vclamps-f32 %v830_v40, 1.0  ;;  %v869_v52 = vsel %vm866_vm11, %v868_v18, %v864_v17 }
 0x1a2   : > { %v870_v54 = vmul.f32 %v869_v52, %v845_v51 }
 0x1a3   : > { %1080 = vmatmul.msk.bf16.vlgmr.msrb.gmra.mxu1 %vm294_vm1, %v1339_v6  ;;  %v875_v46 = vadd.f32 1.0, %v1077_v43 }
 0x1a4   : > { %v1078_v55 = vclamps-f32 %v870_v54, 1.0 }
 0x1a5   : > { %v879_v47 = vmul.f32 %v875_v46, %v707_v24 }
 0x1a6   : > { %v876_v20 = vadd.f32 1.0, %v1078_v55 }
 0x1a7   : > { %v883_v53 = vpack.c.bf16 %v879_v47, %v879_v47 }
 0x1a8   : > { %v880_v59 = vmul.f32 %v876_v20, %v708_v58 }
 0x1a9   : > { %v892_v22 = vsel %vm298_vm0, %v883_v53, 0 }
 0x1aa   : > { %930 = vmatpush.bf16.msrb.mxu2 %v892_v22  ;;  %v884_v60 = vpack.c.bf16 %v880_v59, %v880_v59 }
 0x1ac   : > { %v895_v61 = vsel %vm298_vm0, %v884_v60, 0 }
 0x1ad   : > { %1081 = vmatmul.msk.bf16.vlgmr.msrb.gmra.mxu2 %vm294_vm1, %v1339_v6  ;;  %943 = vmatpush.bf16.msrb.mxu3 %v895_v61 }
 0x1b0   : > { %1082 = vmatmul.msk.bf16.vlgmr.msrb.gmra.mxu3 %vm294_vm1, %v1339_v6 }
 0x21d   : > { %v906_v42 = vpop.f32.mrf.mxu0 }
 0x21e   : > { %v907_v56 = vadd.f32 %v906_v42, %v1367_v44 }
 0x220   : > { %v919_v62 = vpop.f32.mrf.mxu1 }
 0x221   : > { %v920_v35 = vadd.f32 %v919_v62, %v1367_v44 }
 0x223   : > { %v953_v7 = vrot.slane %v920_v35, 6 }
 0x225   : > { %v908_v1 = vpop.f32.mrf.mxu0  ;;  %v956_v6 = vsel %vm617_vm4, %v907_v56, %v953_v7 }
 0x228   : > { %v921_v0 = vpop.f32.mrf.mxu1 }
 0x230   : > { %v932_v2 = vpop.f32.mrf.mxu2 }
 0x231   : > { %v933_v27 = vadd.f32 %v932_v2, %v1367_v44 }
 0x233   : > { %v945_v4 = vpop.f32.mrf.mxu3  ;;  %v954_v38 = vrot.slane %v933_v27, 4 }
 0x234   : > { %v946_v8 = vadd.f32 %v945_v4, %v1367_v44 }
 0x236   : > { %v955_v57 = vrot.slane %v946_v8, 2 }
 0x238   : > { %v934_v5 = vpop.f32.mrf.mxu2  ;;  %v957_v28 = vsel %vm619_vm5, %v954_v38, %v955_v57 }
 0x239   : > { %v958_v9 = vsel %vm621_vm6, %v956_v6, %v957_v28 }
 0x23a   : > { %1083 = vst [vmem:[%s1394_s11 + $0x8] sm:$0xff] %v958_v9 }
 0x23b   : > { %v947_v10 = vpop.f32.mrf.mxu3 }
 0x23c PF: > { %s15_s20 = sadd.s32 1, %s1152_s20   ;;  %s1516_s18 = smov %s1148_s19 }
 0x23d   : > { %p12_p5 = scmp.ge.s32.totalorder %s15_s20, 4   ;;  %s1517_s19 = smov %s1519_s21 }
 0x23f   :  { %14 = sbr.rel (!%p12_p5) target bundleno = 2 (0x2), region = 72 }

</bundles_post_ra>
